<compile_context>
chip_gen: v7x
topology: tpu7x:2x2x1
jax: 0.10.0
libtpu: 0.0.40
codegen_flags: <defaults>
</compile_context>

<pallas_src>
import functools
import jax
import jax.numpy as jnp
from jax.experimental import pallas as pl
from jax.experimental.pallas import tpu as pltpu

_MIB = 1024 * 1024


def _layernorm(v, g, b, eps=1e-5):
    # LayerNorm in fp32 (matches the fp16-safe LayerNorm subclass).
    mu = jnp.mean(v, axis=-1, keepdims=True)
    var = jnp.mean(jnp.square(v - mu), axis=-1, keepdims=True)
    return (v - mu) * jax.lax.rsqrt(var + eps) * g + b


def _attn_kernel(n_head,
                 x_ref, g1_ref, b1_ref, wqkv_ref, bqkv_ref, wo_ref, bo_ref,
                 o_ref, ctx_ref):
    """One batch element: o = x + out_proj(MHA(LN1(x)))."""
    x = x_ref[...].astype(jnp.float32)                      # (L, E)
    L, E = x.shape
    Dh = E // n_head
    cdt = wqkv_ref.dtype                                    # MXU compute dtype

    # Hoisted single loads / broadcasts of the small parameters.
    g1 = g1_ref[...].astype(jnp.float32)
    b1 = b1_ref[...].astype(jnp.float32)
    bqkv = bqkv_ref[...].astype(jnp.float32)                # (1, 3E)
    bo = bo_ref[...].astype(jnp.float32)                    # (1, E)

    ln1 = _layernorm(x, g1, b1)

    # Fused QKV projection (1/sqrt(Dh) already folded into the Q columns); cast to the
    # compute dtype ONCE so the per-head slices below carry no extra VPU casts.
    qkv = (jnp.dot(ln1.astype(cdt), wqkv_ref[...],
                   preferred_element_type=jnp.float32) + bqkv).astype(cdt)   # (L, 3E)

    # Per-head attention.  Each head's context goes into its static lane slot of the
    # (L, E) VMEM scratch slab; the output projection then runs as ONE K=E matmul.
    # TODO(synk): for Dh==64 the h*Dh lane offsets are not 128-aligned; a head-pair
    # column swizzle of the QKV weights would remove the masked lane slices.
    for h in range(n_head):
        qh = qkv[:, 0 * E + h * Dh: 0 * E + (h + 1) * Dh]   # (L, Dh)
        kh = qkv[:, 1 * E + h * Dh: 1 * E + (h + 1) * Dh]
        vh = qkv[:, 2 * E + h * Dh: 2 * E + (h + 1) * Dh]

        # q @ k^T expressed as an NT dot_general (no materialized transpose).
        s = jax.lax.dot_general(qh, kh, (((1,), (1,)), ((), ())),
                                preferred_element_type=jnp.float32)          # (L, L)
        s = s - jnp.max(s, axis=-1, keepdims=True)
        p = jnp.exp(s)
        p = p * pl.reciprocal(jnp.sum(p, axis=-1, keepdims=True), approx=True)

        ctx_ref[:, h * Dh:(h + 1) * Dh] = jnp.dot(
            p.astype(cdt), vh, preferred_element_type=jnp.float32)           # (L, Dh)

    attn = jnp.dot(ctx_ref[...].astype(cdt), wo_ref[...],
                   preferred_element_type=jnp.float32)                       # (L, E)
    o_ref[...] = (x + attn + bo).astype(o_ref.dtype)


def _mlp_kernel(x_ref, g2_ref, b2_ref, wfc_ref, bfc_ref, wproj_ref, bproj_ref,
                o_ref):
    """Row tile: o = x + c_proj(QuickGELU(c_fc(LN2(x))))."""
    x = x_ref[...].astype(jnp.float32)                      # (TM, E)
    cdt = wfc_ref.dtype

    g2 = g2_ref[...].astype(jnp.float32)
    b2 = b2_ref[...].astype(jnp.float32)
    bfc = bfc_ref[...].astype(jnp.float32)
    bproj = bproj_ref[...].astype(jnp.float32)

    ln2 = _layernorm(x, g2, b2)
    h = jnp.dot(ln2.astype(cdt), wfc_ref[...],
                preferred_element_type=jnp.float32) + bfc                    # (TM, 4E)
    h = h * jax.nn.sigmoid(1.702 * h)                                        # QuickGELU, f32
    m = jnp.dot(h.astype(cdt), wproj_ref[...],
                preferred_element_type=jnp.float32) + bproj                  # (TM, E)
    o_ref[...] = (x + m).astype(o_ref.dtype)


# --------------------------------------------------------------------------------------
# Wrapper helpers
# --------------------------------------------------------------------------------------
def _try_in_order(*builders):
    """Run the call-builders in order; return the first that compiles and runs."""
    for b in builders[:-1]:
        try:
            return b()
        except Exception:      # fall back to a more conservative spec variant
            pass
    return builders[-1]()


def _const_spec(a, single_buffer):
    idx = lambda *_: (0,) * a.ndim
    if single_buffer:
        # Constant operands (index_map never changes): double-buffering is pure VMEM waste.
        return pl.BlockSpec(a.shape, idx, pipeline_mode=pl.Buffered(1))
    return pl.BlockSpec(a.shape, idx)


def _vmem_budget_and_mlp_tile():
    """Generation-aware scoped-VMEM budget and default MLP row tile."""
    try:
        cap = int(getattr(pltpu.get_tpu_info(), "vmem_capacity_bytes", 0))
    except Exception:
        cap = 0
    if cap >= 96 * _MIB:        # v4 / v5e / v6e class: 128 MiB physical VMEM
        return 100 * _MIB, 512
    # Unknown or v7x class (64 MiB physical): leave headroom for compiler scratch.
    return 52 * _MIB, 256


def _vmem_limit(est_bytes, budget_bytes):
    if est_bytes <= 32 * _MIB:
        return None             # default scoped limit already suffices (e.g. toy shapes)
    return int(min(budget_bytes, max(40 * _MIB, est_bytes + 4 * _MIB)))


def _nbytes(*arrs):
    return sum(int(a.size) * a.dtype.itemsize for a in arrs)


# --------------------------------------------------------------------------------------
# Public forward
# --------------------------------------------------------------------------------------
def residual_attention_block(x, params, n_head, *,
                             compute_dtype=jnp.bfloat16, mlp_row_tile=None):
    """x: (L, N, E) float32 (seq, batch, d_model).  params: PyTorch-shaped weights."""
    L, N, E = x.shape
    H = n_head
    assert E % H == 0
    Dh = E // H
    f32 = jnp.float32
    cbytes = jnp.dtype(compute_dtype).itemsize
    # TODO(synk): attn_mask is None in this instantiation; an additive/causal mask is
    # not wired into the attention kernel.

    xf = x.astype(f32)          # native (L, N, E) layout; no HBM transposes anywhere

    # ---- trace-time weight prep: transpose, fold attention scale, cast to compute dtype ----
    scale = 1.0 / (Dh ** 0.5)
    qscale = jnp.concatenate([jnp.full((E,), scale, f32), jnp.ones((2 * E,), f32)])
    wqkv_t = (params["in_proj_w"].astype(f32).T * qscale[None, :]).astype(compute_dtype)  # (E, 3E)
    bqkv = (params["in_proj_b"].astype(f32) * qscale).reshape(1, 3 * E)
    wo_t = params["out_proj_w"].astype(f32).T.astype(compute_dtype)                       # (E, E)
    bo = params["out_proj_b"].astype(f32).reshape(1, E)
    wfc_t = params["fc_w"].astype(f32).T.astype(compute_dtype)                            # (E, 4E)
    bfc = params["fc_b"].astype(f32).reshape(1, 4 * E)
    wproj_t = params["proj_w"].astype(f32).T.astype(compute_dtype)                        # (4E, E)
    bproj = params["proj_b"].astype(f32).reshape(1, E)
    g1 = params["ln1_g"].astype(f32).reshape(1, E)
    b1 = params["ln1_b"].astype(f32).reshape(1, E)
    g2 = params["ln2_g"].astype(f32).reshape(1, E)
    b2 = params["ln2_b"].astype(f32).reshape(1, E)
    # TODO(synk): on v7x, wfc_t/wproj_t could be kept fp8 (per-channel scales applied after
    # the f32-accumulated matmul) to halve MLP weight DMA/VMEM under the 64 MiB budget.

    vmem_budget, default_tile = _vmem_budget_and_mlp_tile()

    # ------------- attention branch + first residual: x1 = x + MHA(LN1(x)) -------------
    attn_w = [g1, b1, wqkv_t, bqkv, wo_t, bo]
    attn_cost = pl.CostEstimate(
        flops=int(N * (2 * L * E * 3 * E + 4 * L * L * E + 2 * L * E * E)),
        transcendentals=int(N * H * L * L + N * H * L),
        bytes_accessed=int(2 * N * L * E * 4 + _nbytes(*attn_w)),
    )
    attn_vmem = _vmem_limit(
        4 * L * E * 4 + 2 * _nbytes(*attn_w)
        + L * 3 * E * cbytes + 3 * L * L * 4 + 2 * L * E * 4,
        vmem_budget)

    def attn_call(single_buffer, native_layout):
        if native_layout:
            # Native (L, N, E): select the per-batch (L, E) slab via a squeezed middle
            # block dim -> strided batch-slab DMA, no extra HBM transpose passes.
            x_in = xf
            io_spec = pl.BlockSpec((L, None, E), lambda n: (0, n, 0))
            o_shape = jax.ShapeDtypeStruct((L, N, E), f32)
        else:
            # Conservative fallback: transpose to (N, L, E) and block the leading dim.
            x_in = jnp.transpose(xf, (1, 0, 2))
            io_spec = pl.BlockSpec((None, L, E), lambda n: (n, 0, 0))
            o_shape = jax.ShapeDtypeStruct((N, L, E), f32)
        y = pl.pallas_call(
            functools.partial(_attn_kernel, H),
            grid=(N,),
            in_specs=[io_spec] + [_const_spec(a, single_buffer) for a in attn_w],
            out_specs=io_spec,
            out_shape=o_shape,
            scratch_shapes=[pltpu.VMEM((L, E), jnp.float32)],   # per-head ctx slab
            compiler_params=pltpu.CompilerParams(
                dimension_semantics=("parallel",), vmem_limit_bytes=attn_vmem),
            cost_estimate=attn_cost,
        )(x_in, *attn_w)
        return y if native_layout else jnp.transpose(y, (1, 0, 2))

    # TODO(synk): for tiny N on v7x (2 TensorCores) the attention grid should also be
    # split over query tiles / head groups (with QKV in its own row-parallel call).
    x1 = _try_in_order(
        lambda: attn_call(True, True),     # single-buffered weights, native layout
        lambda: attn_call(False, True),    # double-buffered weights, native layout
        lambda: attn_call(False, False),   # fully conservative variant
    )                                      # x1: (L, N, E) f32

    # ------------- MLP branch + second residual, row-parallel over all L*N rows -------------
    # TODO(synk): on v5e, storing x1 in bf16 (residual add kept f32 in-kernel) would halve
    # the inter-call HBM round trip; kept f32 here as the correctness baseline.
    R = L * N
    rows = x1.reshape(R, E)                # contiguous reshape: no copy, no padding
    TM = int(min(default_tile if mlp_row_tile is None else mlp_row_tile, R))
    if TM != R and TM % 8 != 0:
        TM = max(8, (TM // 8) * 8)
    num_tiles = int(pl.cdiv(R, TM))        # partial trailing block (if any) is masked;
                                           # all ops are row-wise so garbage rows are inert.

    mlp_w = [g2, b2, wfc_t, bfc, wproj_t, bproj]
    mlp_cost = pl.CostEstimate(
        flops=int(16 * R * E * E),
        transcendentals=int(R * 4 * E),
        bytes_accessed=int(2 * R * E * 4 + _nbytes(*mlp_w)),
    )
    mlp_vmem = _vmem_limit(
        4 * TM * E * 4 + 2 * _nbytes(*mlp_w) + 2 * TM * 4 * E * 4 + TM * 4 * E * cbytes,
        vmem_budget)

    def mlp_call(single_buffer):
        return pl.pallas_call(
            _mlp_kernel,
            grid=(num_tiles,),
            in_specs=[pl.BlockSpec((TM, E), lambda i: (i, 0))]
                     + [_const_spec(a, single_buffer) for a in mlp_w],
            out_specs=pl.BlockSpec((TM, E), lambda i: (i, 0)),
            out_shape=jax.ShapeDtypeStruct((R, E), f32),
            compiler_params=pltpu.CompilerParams(
                dimension_semantics=("parallel",), vmem_limit_bytes=mlp_vmem),
            cost_estimate=mlp_cost,
        )(rows, *mlp_w)

    out_rows = _try_in_order(lambda: mlp_call(True), lambda: mlp_call(False))
    return out_rows.reshape(L, N, E).astype(x.dtype)


# --------------------------------------------------------------------------------------
# Pure-JAX reference and test
# --------------------------------------------------------------------------------------
def ref_forward(x, p, n_head):
    """Pure-JAX f32 reference mirroring the PyTorch forward (for verification)."""
    L, N, E = x.shape
    Dh = E // n_head
    scale = 1.0 / (Dh ** 0.5)

    def ln(v, g, b):
        mu = jnp.mean(v, axis=-1, keepdims=True)
        var = jnp.mean((v - mu) ** 2, axis=-1, keepdims=True)
        return (v - mu) * jax.lax.rsqrt(var + 1e-5) * g + b

    h = ln(x, p["ln1_g"], p["ln1_b"])
    qkv = jnp.einsum("lne,fe->lnf", h, p["in_proj_w"]) + p["in_proj_b"]
    q, k, v = jnp.split(qkv, 3, axis=-1)
    q = q.reshape(L, N, n_head, Dh)
    k = k.reshape(L, N, n_head, Dh)
    v = v.reshape(L, N, n_head, Dh)
    s = jnp.einsum("qnhd,knhd->nhqk", q, k) * scale
    p_attn = jax.nn.softmax(s, axis=-1)
    o = jnp.einsum("nhqk,knhd->qnhd", p_attn, v).reshape(L, N, E)
    o = jnp.einsum("lne,fe->lnf", o, p["out_proj_w"]) + p["out_proj_b"]
    x = x + o

    h2 = ln(x, p["ln2_g"], p["ln2_b"])
    h2 = jnp.einsum("lne,fe->lnf", h2, p["fc_w"]) + p["fc_b"]
    h2 = h2 * jax.nn.sigmoid(1.702 * h2)
    h2 = jnp.einsum("lnf,ef->lne", h2, p["proj_w"]) + p["proj_b"]
    return x + h2


def make_params(key, d_model, n_head):
    E = d_model
    ks = jax.random.split(key, 6)
    s = 0.02
    return {
        "ln1_g": jnp.ones((E,), jnp.float32),
        "ln1_b": jnp.zeros((E,), jnp.float32),
        "in_proj_w": s * jax.random.normal(ks[0], (3 * E, E), jnp.float32),
        "in_proj_b": s * jax.random.normal(ks[1], (3 * E,), jnp.float32),
        "out_proj_w": s * jax.random.normal(ks[2], (E, E), jnp.float32),
        "out_proj_b": jnp.zeros((E,), jnp.float32),
        "ln2_g": jnp.ones((E,), jnp.float32),
        "ln2_b": jnp.zeros((E,), jnp.float32),
        "fc_w": s * jax.random.normal(ks[3], (4 * E, E), jnp.float32),
        "fc_b": s * jax.random.normal(ks[4], (4 * E,), jnp.float32),
        "proj_w": s * jax.random.normal(ks[5], (E, 4 * E), jnp.float32),
        "proj_b": jnp.zeros((E,), jnp.float32),
    }


if __name__ == "__main__":
    # Small shapes consistent with the module: seq=8, batch=2, d_model=32, n_head=4.
    L, N, E, H = 8, 2, 32, 4
    key = jax.random.PRNGKey(0)
    kx, kp = jax.random.split(key)
    x = jax.random.normal(kx, (L, N, E), jnp.float32)
    params = make_params(kp, E, H)

    ref = ref_forward(x, params, H)

    # bf16-MXU path (default): looser tolerance for bf16 matmuls + approx reciprocal.
    out = jax.block_until_ready(residual_attention_block(x, params, H))
    assert out.shape == (L, N, E)
    assert jnp.allclose(out, ref, atol=2e-2, rtol=2e-2), float(jnp.max(jnp.abs(out - ref)))

    # f32 compute path: tighter check of the wiring (approx-reciprocal slack only).
    out32 = jax.block_until_ready(
        residual_attention_block(x, params, H, compute_dtype=jnp.float32))
    assert jnp.allclose(out32, ref, atol=5e-3, rtol=5e-3), float(jnp.max(jnp.abs(out32 - ref)))

    print("KERNEL_OK")
</pallas_src>

<mosaic_0001>
module attributes {stable_mosaic.version = 11 : i64} {
  func.func @_attn_kernel(%arg0: i32, %arg1: memref<1x8x32xf32, #tpu.memory_space<vmem>>, %arg2: memref<1x32xf32, #tpu.memory_space<vmem>>, %arg3: memref<1x32xf32, #tpu.memory_space<vmem>>, %arg4: memref<32x96xbf16, #tpu.memory_space<vmem>>, %arg5: memref<1x96xf32, #tpu.memory_space<vmem>>, %arg6: memref<32x32xbf16, #tpu.memory_space<vmem>>, %arg7: memref<1x32xf32, #tpu.memory_space<vmem>>, %arg8: memref<1x8x32xf32, #tpu.memory_space<vmem>>, %arg9: memref<8x32xf32, #tpu.memory_space<vmem>>) attributes {dimension_semantics = [#tpu.dimension_semantics<parallel>], iteration_bounds = array<i64: 2>, scalar_prefetch = 0 : i64, scratch_operands = 1 : i64, tpu.core_type = #tpu.core_type<tc>, window_params = [{transform_indices = @transform_0, window_bounds = array<i64: 1, 8, 32>}, {pipeline_mode = #tpu.pipeline_mode<synchronous>, transform_indices = @transform_1, window_bounds = array<i64: 1, 32>}, {pipeline_mode = #tpu.pipeline_mode<synchronous>, transform_indices = @transform_2, window_bounds = array<i64: 1, 32>}, {pipeline_mode = #tpu.pipeline_mode<synchronous>, transform_indices = @transform_3, window_bounds = array<i64: 32, 96>}, {pipeline_mode = #tpu.pipeline_mode<synchronous>, transform_indices = @transform_4, window_bounds = array<i64: 1, 96>}, {pipeline_mode = #tpu.pipeline_mode<synchronous>, transform_indices = @transform_5, window_bounds = array<i64: 32, 32>}, {pipeline_mode = #tpu.pipeline_mode<synchronous>, transform_indices = @transform_6, window_bounds = array<i64: 1, 32>}, {transform_indices = @transform_7, window_bounds = array<i64: 1, 8, 32>}]} {
    %c0 = arith.constant 0 : index
    %c0_0 = arith.constant 0 : index
    %c0_1 = arith.constant 0 : index
    %0 = vector.load %arg1[%c0, %c0_0, %c0_1] : memref<1x8x32xf32, #tpu.memory_space<vmem>>, vector<1x8x32xf32>
    %1 = vector.shape_cast %0 : vector<1x8x32xf32> to vector<8x32xf32>
    %c0_2 = arith.constant 0 : index
    %c0_3 = arith.constant 0 : index
    %2 = vector.load %arg2[%c0_2, %c0_3] : memref<1x32xf32, #tpu.memory_space<vmem>>, vector<1x32xf32>
    %c0_4 = arith.constant 0 : index
    %c0_5 = arith.constant 0 : index
    %3 = vector.load %arg3[%c0_4, %c0_5] : memref<1x32xf32, #tpu.memory_space<vmem>>, vector<1x32xf32>
    %c0_6 = arith.constant 0 : index
    %c0_7 = arith.constant 0 : index
    %4 = vector.load %arg5[%c0_6, %c0_7] : memref<1x96xf32, #tpu.memory_space<vmem>>, vector<1x96xf32>
    %c0_8 = arith.constant 0 : index
    %c0_9 = arith.constant 0 : index
    %5 = vector.load %arg7[%c0_8, %c0_9] : memref<1x32xf32, #tpu.memory_space<vmem>>, vector<1x32xf32>
    %cst = arith.constant dense<0.000000e+00> : vector<8xf32>
    %6 = vector.multi_reduction <add>, %1, %cst [1] : vector<8x32xf32> to vector<8xf32>
    %7 = vector.shape_cast %6 : vector<8xf32> to vector<8x1xf32>
    %cst_10 = arith.constant 3.200000e+01 : f32
    %8 = vector.broadcast %cst_10 : f32 to vector<8x1xf32>
    %9 = arith.divf %7, %8 : vector<8x1xf32>
    %10 = vector.broadcast %9 : vector<8x1xf32> to vector<8x32xf32>
    %11 = arith.subf %1, %10 : vector<8x32xf32>
    %12 = arith.mulf %11, %11 : vector<8x32xf32>
    %cst_11 = arith.constant dense<0.000000e+00> : vector<8xf32>
    %13 = vector.multi_reduction <add>, %12, %cst_11 [1] : vector<8x32xf32> to vector<8xf32>
    %14 = vector.shape_cast %13 : vector<8xf32> to vector<8x1xf32>
    %cst_12 = arith.constant 3.200000e+01 : f32
    %15 = vector.broadcast %cst_12 : f32 to vector<8x1xf32>
    %16 = arith.divf %14, %15 : vector<8x1xf32>
    %17 = vector.broadcast %9 : vector<8x1xf32> to vector<8x32xf32>
    %18 = arith.subf %1, %17 : vector<8x32xf32>
    %cst_13 = arith.constant 9.99999974E-6 : f32
    %19 = vector.broadcast %cst_13 : f32 to vector<8x1xf32>
    %20 = arith.addf %16, %19 : vector<8x1xf32>
    %21 = math.rsqrt %20 : vector<8x1xf32>
    %22 = vector.broadcast %21 : vector<8x1xf32> to vector<8x32xf32>
    %23 = arith.mulf %18, %22 : vector<8x32xf32>
    %24 = vector.broadcast %2 : vector<1x32xf32> to vector<8x32xf32>
    %25 = arith.mulf %23, %24 : vector<8x32xf32>
    %26 = vector.broadcast %3 : vector<1x32xf32> to vector<8x32xf32>
    %27 = arith.addf %25, %26 : vector<8x32xf32>
    %28 = arith.truncf %27 : vector<8x32xf32> to vector<8x32xbf16>
    %c0_14 = arith.constant 0 : index
    %c0_15 = arith.constant 0 : index
    %29 = vector.load %arg4[%c0_14, %c0_15] : memref<32x96xbf16, #tpu.memory_space<vmem>>, vector<32x96xbf16>
    %cst_16 = arith.constant dense<0.000000e+00> : vector<8x96xf32>
    %30 = tpu.matmul %28, %29, %cst_16 {dimension_numbers = #tpu.dot_dimension_numbers<[1], [0], [0], [1], [0, 0, 1, 1], [], []>} : vector<8x32xbf16>, vector<32x96xbf16>, vector<8x96xf32> -> vector<8x96xf32>
    %31 = vector.broadcast %4 : vector<1x96xf32> to vector<8x96xf32>
    %32 = arith.addf %30, %31 : vector<8x96xf32>
    %33 = arith.truncf %32 : vector<8x96xf32> to vector<8x96xbf16>
    %34 = vector.extract_strided_slice %33 {offsets = [0, 0], sizes = [8, 8], strides = [1, 1]} : vector<8x96xbf16> to vector<8x8xbf16>
    %35 = vector.extract_strided_slice %33 {offsets = [0, 32], sizes = [8, 8], strides = [1, 1]} : vector<8x96xbf16> to vector<8x8xbf16>
    %36 = vector.extract_strided_slice %33 {offsets = [0, 64], sizes = [8, 8], strides = [1, 1]} : vector<8x96xbf16> to vector<8x8xbf16>
    %cst_17 = arith.constant dense<0.000000e+00> : vector<8x8xf32>
    %37 = tpu.matmul %34, %35, %cst_17 {dimension_numbers = #tpu.dot_dimension_numbers<[1], [1], [0], [0], [0, 0, 1, 0], [], []>} : vector<8x8xbf16>, vector<8x8xbf16>, vector<8x8xf32> -> vector<8x8xf32>
    %cst_18 = arith.constant dense<0xFF800000> : vector<8xf32>
    %38 = vector.multi_reduction <maximumf>, %37, %cst_18 [1] : vector<8x8xf32> to vector<8xf32>
    %39 = vector.shape_cast %38 : vector<8xf32> to vector<8x1xf32>
    %40 = vector.broadcast %39 : vector<8x1xf32> to vector<8x8xf32>
    %41 = arith.subf %37, %40 : vector<8x8xf32>
    %42 = math.exp %41 : vector<8x8xf32>
    %cst_19 = arith.constant dense<0.000000e+00> : vector<8xf32>
    %43 = vector.multi_reduction <add>, %42, %cst_19 [1] : vector<8x8xf32> to vector<8xf32>
    %44 = vector.shape_cast %43 : vector<8xf32> to vector<8x1xf32>
    %45 = tpu.reciprocal %44 {approx = true} : vector<8x1xf32> -> vector<8x1xf32>
    %46 = vector.broadcast %45 : vector<8x1xf32> to vector<8x8xf32>
    %47 = arith.mulf %42, %46 : vector<8x8xf32>
    %48 = arith.truncf %47 : vector<8x8xf32> to vector<8x8xbf16>
    %cst_20 = arith.constant dense<0.000000e+00> : vector<8x8xf32>
    %49 = tpu.matmul %48, %36, %cst_20 {dimension_numbers = #tpu.dot_dimension_numbers<[1], [0], [0], [1], [0, 0, 1, 1], [], []>} : vector<8x8xbf16>, vector<8x8xbf16>, vector<8x8xf32> -> vector<8x8xf32>
    %c0_21 = arith.constant 0 : index
    %c0_22 = arith.constant 0 : index
    %50 = vector.load %arg9[%c0_21, %c0_22] : memref<8x32xf32, #tpu.memory_space<vmem>>, vector<8x8xf32>
    tpu.vector_store %arg9[%c0_21, %c0_22], %49 {strides = array<i32>} : memref<8x32xf32, #tpu.memory_space<vmem>>, vector<8x8xf32>,
    %51 = vector.extract_strided_slice %33 {offsets = [0, 8], sizes = [8, 8], strides = [1, 1]} : vector<8x96xbf16> to vector<8x8xbf16>
    %52 = vector.extract_strided_slice %33 {offsets = [0, 40], sizes = [8, 8], strides = [1, 1]} : vector<8x96xbf16> to vector<8x8xbf16>
    %53 = vector.extract_strided_slice %33 {offsets = [0, 72], sizes = [8, 8], strides = [1, 1]} : vector<8x96xbf16> to vector<8x8xbf16>
    %cst_23 = arith.constant dense<0.000000e+00> : vector<8x8xf32>
    %54 = tpu.matmul %51, %52, %cst_23 {dimension_numbers = #tpu.dot_dimension_numbers<[1], [1], [0], [0], [0, 0, 1, 0], [], []>} : vector<8x8xbf16>, vector<8x8xbf16>, vector<8x8xf32> -> vector<8x8xf32>
    %cst_24 = arith.constant dense<0xFF800000> : vector<8xf32>
    %55 = vector.multi_reduction <maximumf>, %54, %cst_24 [1] : vector<8x8xf32> to vector<8xf32>
    %56 = vector.shape_cast %55 : vector<8xf32> to vector<8x1xf32>
    %57 = vector.broadcast %56 : vector<8x1xf32> to vector<8x8xf32>
    %58 = arith.subf %54, %57 : vector<8x8xf32>
    %59 = math.exp %58 : vector<8x8xf32>
    %cst_25 = arith.constant dense<0.000000e+00> : vector<8xf32>
    %60 = vector.multi_reduction <add>, %59, %cst_25 [1] : vector<8x8xf32> to vector<8xf32>
    %61 = vector.shape_cast %60 : vector<8xf32> to vector<8x1xf32>
    %62 = tpu.reciprocal %61 {approx = true} : vector<8x1xf32> -> vector<8x1xf32>
    %63 = vector.broadcast %62 : vector<8x1xf32> to vector<8x8xf32>
    %64 = arith.mulf %59, %63 : vector<8x8xf32>
    %65 = arith.truncf %64 : vector<8x8xf32> to vector<8x8xbf16>
    %cst_26 = arith.constant dense<0.000000e+00> : vector<8x8xf32>
    %66 = tpu.matmul %65, %53, %cst_26 {dimension_numbers = #tpu.dot_dimension_numbers<[1], [0], [0], [1], [0, 0, 1, 1], [], []>} : vector<8x8xbf16>, vector<8x8xbf16>, vector<8x8xf32> -> vector<8x8xf32>
    %c0_27 = arith.constant 0 : index
    %c8 = arith.constant 8 : index
    %67 = vector.load %arg9[%c0_27, %c8] : memref<8x32xf32, #tpu.memory_space<vmem>>, vector<8x8xf32>
    tpu.vector_store %arg9[%c0_27, %c8], %66 {strides = array<i32>} : memref<8x32xf32, #tpu.memory_space<vmem>>, vector<8x8xf32>,
    %68 = vector.extract_strided_slice %33 {offsets = [0, 16], sizes = [8, 8], strides = [1, 1]} : vector<8x96xbf16> to vector<8x8xbf16>
    %69 = vector.extract_strided_slice %33 {offsets = [0, 48], sizes = [8, 8], strides = [1, 1]} : vector<8x96xbf16> to vector<8x8xbf16>
    %70 = vector.extract_strided_slice %33 {offsets = [0, 80], sizes = [8, 8], strides = [1, 1]} : vector<8x96xbf16> to vector<8x8xbf16>
    %cst_28 = arith.constant dense<0.000000e+00> : vector<8x8xf32>
    %71 = tpu.matmul %68, %69, %cst_28 {dimension_numbers = #tpu.dot_dimension_numbers<[1], [1], [0], [0], [0, 0, 1, 0], [], []>} : vector<8x8xbf16>, vector<8x8xbf16>, vector<8x8xf32> -> vector<8x8xf32>
    %cst_29 = arith.constant dense<0xFF800000> : vector<8xf32>
    %72 = vector.multi_reduction <maximumf>, %71, %cst_29 [1] : vector<8x8xf32> to vector<8xf32>
    %73 = vector.shape_cast %72 : vector<8xf32> to vector<8x1xf32>
    %74 = vector.broadcast %73 : vector<8x1xf32> to vector<8x8xf32>
    %75 = arith.subf %71, %74 : vector<8x8xf32>
    %76 = math.exp %75 : vector<8x8xf32>
    %cst_30 = arith.constant dense<0.000000e+00> : vector<8xf32>
    %77 = vector.multi_reduction <add>, %76, %cst_30 [1] : vector<8x8xf32> to vector<8xf32>
    %78 = vector.shape_cast %77 : vector<8xf32> to vector<8x1xf32>
    %79 = tpu.reciprocal %78 {approx = true} : vector<8x1xf32> -> vector<8x1xf32>
    %80 = vector.broadcast %79 : vector<8x1xf32> to vector<8x8xf32>
    %81 = arith.mulf %76, %80 : vector<8x8xf32>
    %82 = arith.truncf %81 : vector<8x8xf32> to vector<8x8xbf16>
    %cst_31 = arith.constant dense<0.000000e+00> : vector<8x8xf32>
    %83 = tpu.matmul %82, %70, %cst_31 {dimension_numbers = #tpu.dot_dimension_numbers<[1], [0], [0], [1], [0, 0, 1, 1], [], []>} : vector<8x8xbf16>, vector<8x8xbf16>, vector<8x8xf32> -> vector<8x8xf32>
    %c0_32 = arith.constant 0 : index
    %c16 = arith.constant 16 : index
    %84 = vector.load %arg9[%c0_32, %c16] : memref<8x32xf32, #tpu.memory_space<vmem>>, vector<8x8xf32>
    tpu.vector_store %arg9[%c0_32, %c16], %83 {strides = array<i32>} : memref<8x32xf32, #tpu.memory_space<vmem>>, vector<8x8xf32>,
    %85 = vector.extract_strided_slice %33 {offsets = [0, 24], sizes = [8, 8], strides = [1, 1]} : vector<8x96xbf16> to vector<8x8xbf16>
    %86 = vector.extract_strided_slice %33 {offsets = [0, 56], sizes = [8, 8], strides = [1, 1]} : vector<8x96xbf16> to vector<8x8xbf16>
    %87 = vector.extract_strided_slice %33 {offsets = [0, 88], sizes = [8, 8], strides = [1, 1]} : vector<8x96xbf16> to vector<8x8xbf16>
    %cst_33 = arith.constant dense<0.000000e+00> : vector<8x8xf32>
    %88 = tpu.matmul %85, %86, %cst_33 {dimension_numbers = #tpu.dot_dimension_numbers<[1], [1], [0], [0], [0, 0, 1, 0], [], []>} : vector<8x8xbf16>, vector<8x8xbf16>, vector<8x8xf32> -> vector<8x8xf32>
    %cst_34 = arith.constant dense<0xFF800000> : vector<8xf32>
    %89 = vector.multi_reduction <maximumf>, %88, %cst_34 [1] : vector<8x8xf32> to vector<8xf32>
    %90 = vector.shape_cast %89 : vector<8xf32> to vector<8x1xf32>
    %91 = vector.broadcast %90 : vector<8x1xf32> to vector<8x8xf32>
    %92 = arith.subf %88, %91 : vector<8x8xf32>
    %93 = math.exp %92 : vector<8x8xf32>
    %cst_35 = arith.constant dense<0.000000e+00> : vector<8xf32>
    %94 = vector.multi_reduction <add>, %93, %cst_35 [1] : vector<8x8xf32> to vector<8xf32>
    %95 = vector.shape_cast %94 : vector<8xf32> to vector<8x1xf32>
    %96 = tpu.reciprocal %95 {approx = true} : vector<8x1xf32> -> vector<8x1xf32>
    %97 = vector.broadcast %96 : vector<8x1xf32> to vector<8x8xf32>
    %98 = arith.mulf %93, %97 : vector<8x8xf32>
    %99 = arith.truncf %98 : vector<8x8xf32> to vector<8x8xbf16>
    %cst_36 = arith.constant dense<0.000000e+00> : vector<8x8xf32>
    %100 = tpu.matmul %99, %87, %cst_36 {dimension_numbers = #tpu.dot_dimension_numbers<[1], [0], [0], [1], [0, 0, 1, 1], [], []>} : vector<8x8xbf16>, vector<8x8xbf16>, vector<8x8xf32> -> vector<8x8xf32>
    %c0_37 = arith.constant 0 : index
    %c24 = arith.constant 24 : index
    %101 = vector.load %arg9[%c0_37, %c24] : memref<8x32xf32, #tpu.memory_space<vmem>>, vector<8x8xf32>
    tpu.vector_store %arg9[%c0_37, %c24], %100 {strides = array<i32>} : memref<8x32xf32, #tpu.memory_space<vmem>>, vector<8x8xf32>,
    %c0_38 = arith.constant 0 : index
    %c0_39 = arith.constant 0 : index
    %102 = vector.load %arg9[%c0_38, %c0_39] : memref<8x32xf32, #tpu.memory_space<vmem>>, vector<8x32xf32>
    %103 = arith.truncf %102 : vector<8x32xf32> to vector<8x32xbf16>
    %c0_40 = arith.constant 0 : index
    %c0_41 = arith.constant 0 : index
    %104 = vector.load %arg6[%c0_40, %c0_41] : memref<32x32xbf16, #tpu.memory_space<vmem>>, vector<32x32xbf16>
    %cst_42 = arith.constant dense<0.000000e+00> : vector<8x32xf32>
    %105 = tpu.matmul %103, %104, %cst_42 {dimension_numbers = #tpu.dot_dimension_numbers<[1], [0], [0], [1], [0, 0, 1, 1], [], []>} : vector<8x32xbf16>, vector<32x32xbf16>, vector<8x32xf32> -> vector<8x32xf32>
    %106 = arith.addf %1, %105 : vector<8x32xf32>
    %107 = vector.broadcast %5 : vector<1x32xf32> to vector<8x32xf32>
    %108 = arith.addf %106, %107 : vector<8x32xf32>
    %c0_43 = arith.constant 0 : index
    %c0_44 = arith.constant 0 : index
    %c0_45 = arith.constant 0 : index
    %109 = vector.load %arg8[%c0_43, %c0_44, %c0_45] : memref<1x8x32xf32, #tpu.memory_space<vmem>>, vector<1x8x32xf32>
    %110 = vector.shape_cast %109 : vector<1x8x32xf32> to vector<8x32xf32>
    %111 = vector.shape_cast %108 : vector<8x32xf32> to vector<1x8x32xf32>
    tpu.vector_store %arg8[%c0_43, %c0_44, %c0_45], %111 {strides = array<i32>} : memref<1x8x32xf32, #tpu.memory_space<vmem>>, vector<1x8x32xf32>,
    return
  }
  func.func @transform_0(%arg0: i32) -> (i32, i32, i32) {
    %c0_i32 = arith.constant 0 : i32
    %c0_i32_0 = arith.constant 0 : i32
    %c0_i32_1 = arith.constant 0 : i32
    return %arg0, %c0_i32, %c0_i32_0 : i32, i32, i32
  }
  func.func @transform_1(%arg0: i32) -> (i32, i32) {
    %c0_i32 = arith.constant 0 : i32
    %c0_i32_0 = arith.constant 0 : i32
    %c0_i32_1 = arith.constant 0 : i32
    return %c0_i32, %c0_i32_0 : i32, i32
  }
  func.func @transform_2(%arg0: i32) -> (i32, i32) {
    %c0_i32 = arith.constant 0 : i32
    %c0_i32_0 = arith.constant 0 : i32
    %c0_i32_1 = arith.constant 0 : i32
    return %c0_i32, %c0_i32_0 : i32, i32
  }
  func.func @transform_3(%arg0: i32) -> (i32, i32) {
    %c0_i32 = arith.constant 0 : i32
    %c0_i32_0 = arith.constant 0 : i32
    %c0_i32_1 = arith.constant 0 : i32
    return %c0_i32, %c0_i32_0 : i32, i32
  }
  func.func @transform_4(%arg0: i32) -> (i32, i32) {
    %c0_i32 = arith.constant 0 : i32
    %c0_i32_0 = arith.constant 0 : i32
    %c0_i32_1 = arith.constant 0 : i32
    return %c0_i32, %c0_i32_0 : i32, i32
  }
  func.func @transform_5(%arg0: i32) -> (i32, i32) {
    %c0_i32 = arith.constant 0 : i32
    %c0_i32_0 = arith.constant 0 : i32
    %c0_i32_1 = arith.constant 0 : i32
    return %c0_i32, %c0_i32_0 : i32, i32
  }
  func.func @transform_6(%arg0: i32) -> (i32, i32) {
    %c0_i32 = arith.constant 0 : i32
    %c0_i32_0 = arith.constant 0 : i32
    %c0_i32_1 = arith.constant 0 : i32
    return %c0_i32, %c0_i32_0 : i32, i32
  }
  func.func @transform_7(%arg0: i32) -> (i32, i32, i32) {
    %c0_i32 = arith.constant 0 : i32
    %c0_i32_0 = arith.constant 0 : i32
    %c0_i32_1 = arith.constant 0 : i32
    return %arg0, %c0_i32, %c0_i32_0 : i32, i32, i32
  }
}

</mosaic_0001>

<bundles_post_ra>
// kernel: tpu_custom_call.1
= control target key start
LH: loop header
LB: loop body
LE: loop exit
PB: predicated region body
PF: predicated region fallthrough
CT: control target
= control target key end

     0   :  { %12 = vsyncpa [#allocation4], 0  ;;  %s1833_s0 = inlined_call_operand.hbm [shape: f32[2,8,32], index: 0, kind: input, shape index: {}]   ;;  %s1834_s1 = inlined_call_operand.vmem [shape: f32[1,32], index: 1, kind: input, shape index: {}]   ;;  %s1835_s2 = inlined_call_operand.vmem [shape: f32[1,32], index: 2, kind: input, shape index: {}]   ;;  %s1836_s3 = inlined_call_operand.hbm [shape: bf16[32,96], index: 3, kind: input, shape index: {}]   ;;  %s1837_s4 = inlined_call_operand.hbm [shape: f32[1,96], index: 4, kind: input, shape index: {}]   ;;  %s1838_s5 = inlined_call_operand.vmem [shape: bf16[32,32], index: 5, kind: input, shape index: {}]   ;;  %s1839_s6 = inlined_call_operand.vmem [shape: f32[1,32], index: 6, kind: input, shape index: {}]   ;;  %s1840_s7 = inlined_call_operand.hbm [shape: f32[2,8,32], index: 7, kind: output, shape index: {}]  }
   0x1   :  { %14 = vsyncpa [#allocation4 + $0x1], 0 }
   0x2   :  { %15 = vsyncpa [#allocation7], 0 }
   0x3   :  { %16 = vsyncpa [#allocation5], 0 }
   0x4   :  { %18 = vsyncpa [#allocation5 + $0x1], 0  ;;  %s1503_s24 = smov 0   ;;  %s1505_s25 = smov 0  }
   0x5   :  { %s1507_s26 = smov 0   ;;  %s1509_s27 = smov 0  }
   0x6 LB: > { %s1524_s28 = sadd.s32 4294967295, %s1439_s27   ;;  %s1056_s29 = sadd.s32 4294967294, %s1439_s27   ;;  %s1439_s27 = sphi %s1509_s27, %s1860_s27   ;;  %s1435_s26 = sphi %s1507_s26, %s1859_s26   ;;  %s1431_s25 = sphi %s1505_s25, %s1858_s25   ;;  %s1427_s24 = sphi %s1503_s24, %s1857_s24  }
   0x7   : > { %p44_p0 = scmp.ne.s32.totalorder %s1431_s25, %s1427_s24  ;;  %p1841_p1 = scmp.eq.s32.totalorder %s1524_s28, 0 }
   0x8   : > { %p200_p3 = scmp.eq.s32.totalorder %s1056_s29, 1  ;;  %p1057_p5 = scmp.ge.s32.totalorder %s1439_s27, 1 }
   0x9   : > { %p1533_p4 = por %p1841_p1, %p44_p0  ;;  %p207_p7 = scmp.lt.s32.totalorder %s1439_s27, 3 }
   0xa   : > { %p1538_p6 = por %p200_p3, %p44_p0  ;;  %s1441_s10 = smov [#allocation6]  }
   0xb   : > { %s1844_s30 = scalar_select %p1533_p4, 1, 0 }
   0xc   : > { %s1845_s8 = scalar_select %p1538_p6, 1, 0 }
   0xd   : > { %p1543_p8 = pnand %p1057_p5, %p207_p7  ;;  %s225_s11 = sshll.u32 %s1441_s10, 4  ;;  %s1547_s11 = int_to_ptr.vmem [resolvable:$true] %s225_s11 }
   0xe   : > { %s1442_s13 = smov [#allocation8]   ;;  %s1283_s17 = scalar_lea.hbm %s1836_s3, 256 }
   0xf   : > { %p1188_p9 = pneg %p1543_p8  ;;  %s239_s14 = sshll.u32 %s1442_s13, 4  ;;  %s1558_s14 = int_to_ptr.vmem [resolvable:$true] %s239_s14 }
  0x10   : > { %p1284_p12 = scmp.ne.s32.totalorder %s1836_s3, %s1283_s17  ;;  %p1290_p5 = scmp.lt.u32.totalorder %s1283_s17, %s1836_s3 }
  0x11   : > { %p1554_p11 = pnand %p1188_p9, %p1841_p1 }
  0x13   : > { %p1285_p13 = pneg %p1554_p11 }
  0x15   : > { %p1286_p0 = pnand %p1285_p13, %p1284_p12 }
  0x17   : > { %p1287_p3 = pneg %p1286_p0 }
  0x19   : > { %p1292_p7 = pnand %p1290_p5, %p1287_p3 }
  0x1b   : > { %1295 = shalt.err (!%p1292_p7)
}
  0x1c   : > { %s1296_s22 = scalar_lea.vmem %s1547_s11, 256  ;;  %p1304_p2 = scmp.lt.s32.totalorder %s1547_s11, %s1547_s11 }
  0x1d   : > { %p1297_p9 = scmp.ne.s32.totalorder %s1547_s11, %s1296_s22  ;;  %p1305_p12 = scmp.lt.s32.totalorder %s1296_s22, %s1296_s22 }
  0x1f   : > { %p1299_p10 = pnand %p1297_p9, %p1285_p13  ;;  %p1306_p0 = por %p1305_p12, %p1304_p2 }
  0x21   : > { %p1300_p1 = pneg %p1299_p10 }
  0x23   : > { %p1307_p6 = pnand %p1306_p0, %p1300_p1 }
  0x25   : > { %1310 = shalt.err (!%p1307_p6)
}
  0x26   : > { %s1443_s23 = smov 64   ;;  %s1444_s29 = smov 4  }
  0x27   : > { %1191 = dma.hbm_to_vmem [thread:$0]  (!%p1554_p11), %s1836_s3, 256, %s1547_s11, [#allocation7], %s1443_s23, %s1443_s23, %s1444_s29  }
  0x28   : > { %s1311_s17 = scalar_lea.hbm %s1837_s4, 16 }
  0x29   : > { %p1312_p2 = scmp.ne.s32.totalorder %s1837_s4, %s1311_s17  ;;  %p1318_p10 = scmp.lt.u32.totalorder %s1311_s17, %s1837_s4 }
  0x2b   : > { %p1314_p1 = pnand %p1312_p2, %p1285_p13 }
  0x2d   : > { %p1315_p6 = pneg %p1314_p1 }
  0x2f   : > { %p1320_p3 = pnand %p1318_p10, %p1315_p6 }
  0x31   : > { %1323 = shalt.err (!%p1320_p3)
}
  0x32   : > { %s1324_s11 = scalar_lea.vmem %s1558_s14, 16  ;;  %s1331_s22 = scalar_lea.vmem %s1558_s14, 32 }
  0x33   : > { %p1325_p5 = scmp.ne.s32.totalorder %s1558_s14, %s1324_s11  ;;  %p1332_p12 = scmp.lt.s32.totalorder %s1558_s14, %s1558_s14 }
  0x34   : > { %p1333_p0 = scmp.lt.s32.totalorder %s1331_s22, %s1324_s11 }
  0x35   : > { %p1327_p7 = pnand %p1325_p5, %p1285_p13 }
  0x36   : > { %p1334_p2 = por %p1333_p0, %p1332_p12 }
  0x37   : > { %p1328_p9 = pneg %p1327_p7 }
  0x39   : > { %p1335_p1 = pnand %p1334_p2, %p1328_p9 }
  0x3b   : > { %1338 = shalt.err (!%p1335_p1)
}
  0x3c   : > { %1194 = dma.hbm_to_vmem [thread:$0]  (!%p1554_p11), %s1837_s4, 16, %s1558_s14, [#allocation7]  }
  0x3d   : > { %s1614_s10 = sadd.s32 1, %s1439_s27   ;;  %s31_s12 = sadd.s32 1, %s1435_s26 }
  0x3e   : > { %s28_s13 = ssub.s32 %s1439_s27, %s1614_s10  ;;  %p38_p13 = scmp.ne.s32.totalorder %s1435_s26, %s1431_s25 }
  0x3f   : > { %p29_p6 = scmp.eq.s32.totalorder %s28_s13, 0  ;;  %p39_p10 = scmp.eq.s32.totalorder %s1439_s27, 0 }
  0x40   : > { %p1848_p3 = scmp.eq.s32.totalorder %s1524_s28, 1  ;;  %p1205_p7 = scmp.lt.s32.totalorder %s1439_s27, 2 }
  0x41   : > { %s1630_s16 = scalar_select %p29_p6, %s1435_s26, %s31_s12  }
  0x42   : > { %p1624_p5 = por %p1848_p3, %p38_p13  ;;  %p40_p9 = por %p39_p10, %p38_p13 }
  0x43   : > { %s256_s17 = sand.u32 1, %s1435_s26   ;;  %s1062_s14 = sshll.u32 %s1439_s27, 7 }
  0x44   : > { %s1849_s15 = scalar_select %p1624_p5, 1, 0 }
  0x45   : > { %s1061_s18 = sshll.u32 %s256_s17, 3  ;;  %s1637_s21 = scalar_lea.hbm %s1833_s0, %s1062_s14 }
  0x46   : > { %s260_s11 = scalar_lea.vmem [#allocation3], %s1061_s18  ;;  %p1641_p11 = pnand %p1205_p7, %p40_p9 }
  0x47   : > { %s267_s22 = sshll.u32 %s260_s11, 4  ;;  %s257_s29 = scalar_lea.sflag [#allocation4], %s256_s17  ;;  %s1639_s22 = int_to_ptr.vmem [resolvable:$true] %s267_s22 }
  0x48   : > { %s1339_s12 = scalar_lea.hbm %s1637_s21, 128  ;;  %p1341_p0 = pneg %p1641_p11 }
  0x49   : > { %p1340_p12 = scmp.ne.s32.totalorder %s1637_s21, %s1339_s12  ;;  %s1344_s14 = scalar_lea.hbm %s1833_s0, 256 }
  0x4a   : > { %p1345_p13 = scmp.lt.u32.totalorder %s1637_s21, %s1833_s0  ;;  %p1346_p6 = scmp.lt.u32.totalorder %s1344_s14, %s1339_s12 }
  0x4b   : > { %p1342_p2 = pnand %p1341_p0, %p1340_p12  ;;  %p1348_p3 = scmp.lt.u32.totalorder %s1339_s12, %s1637_s21 }
  0x4c   : > { %p1347_p10 = por %p1346_p6, %p1345_p13 }
  0x4d   : > { %p1343_p1 = pneg %p1342_p2 }
  0x4e   : > { %p1349_p7 = por %p1348_p3, %p1347_p10 }
  0x50   : > { %p1350_p9 = pnand %p1349_p7, %p1343_p1 }
  0x52   : > { %1353 = shalt.err (!%p1350_p9)
}
  0x53   : > { %s1354_s17 = scalar_lea.vmem %s1639_s22, 128  ;;  %s1445_s11 = smov [#allocation3]  }
  0x54   : > { %p1355_p12 = scmp.ne.s32.totalorder %s1639_s22, %s1354_s17  ;;  %s1359_s13 = sshll.u32 %s1445_s11, 4  ;;  %s1360_s13 = int_to_ptr.vmem [resolvable:$false] %s1359_s13 }
  0x55   : > { %s1361_s18 = scalar_lea.vmem %s1360_s13, 256  ;;  %p1362_p4 = scmp.lt.s32.totalorder %s1639_s22, %s1360_s13 }
  0x56   : > { %p1357_p2 = pnand %p1355_p12, %p1341_p0  ;;  %p1363_p13 = scmp.lt.s32.totalorder %s1361_s18, %s1354_s17 }
  0x58   : > { %p1358_p5 = pneg %p1357_p2  ;;  %p1364_p6 = por %p1363_p13, %p1362_p4 }
  0x5a   : > { %p1365_p10 = pnand %p1364_p6, %p1358_p5 }
  0x5c   : > { %1368 = shalt.err (!%p1365_p10)
}
  0x5d   : > { %1198 = dma.hbm_to_vmem [thread:$0]  (!%p1641_p11), %s1637_s21, 128, %s1639_s22, %s257_s29  }
  0x5e   : > { %276 = sbr.rel (%p1543_p8) target bundleno = 1916 (0x77c), region = 48  ;;  %s1673_s12 = sand.u32 (!%p1543_p8), 1, %s1431_s25  }
  0x5f   : > { %s1064_s14 = sshll.u32 (!%p1543_p8), %s1673_s12, 3  ;;  %s279_s19 = scalar_lea.sflag (!%p1543_p8), [#allocation4], %s1673_s12 }
  0x60   : > { %s282_s20 = scalar_lea.vmem (!%p1543_p8), [#allocation3], %s1064_s14  ;;  %p1851_p4 = scmp.ne.s32.totalorder (!%p1543_p8), %s1844_s30, 0 }
  0x65   : > { %1414 = dma.done.wait (%p1851_p4), %s279_s19, 128  }
  0x66   : > { %1416 = vsyncadd (%p1851_p4), %s279_s19, 4294967168  ;;  %p1852_p5 = scmp.eq.s32.totalorder %s1524_s28, 0 }
  0x68   : > { %1418 = dma.done.wait (%p1852_p5), [#allocation7], 272   ;;  %p1853_p8 = pmov %p1852_p5 }
  0x69   : > { %vm327_vm0 = vcmask 261120   ;;  %v1687_v0 = vld [vmem:[%s282_s20] sm:$0xff]  ;;  %v1261_v7 = vld [vmem:[#allocation6] sm:$0xff]   ;;  %v1446_v8 = vmov 0.0   ;;  %vm1447_vm1 = vmmov 0   ;;  %v1262_v9 = vld [vmem:[#allocation6 + $0x8] sm:$0xff]  }
  0x6a   : > { %1420 = vsyncadd (%p1853_p8), [#allocation7], 4294967024  ;;  %v328_v1 = vsel %vm327_vm0, %v1687_v0, 0.0  ;;  %1112 = vmatprep.subr.bf16.mxu0 %v1446_v8  ;;  %1116 = vmatprep.mubr.msk.bf16.mxu0 %vm1447_vm1, %v1446_v8  ;;  %v1068_v14 = vld [vmem:[%s1834_s1] ss:$0 sm:$0xff]  ;;  %s1448_s23 = smov 120  }
  0x6b   : > { %329 = vadd.xlane.f32.xlu0 %v328_v1  ;;  %1113 = vmatpush3.bf16.msra.mxu0 %v1261_v7  ;;  %v1069_v16 = vld [vmem:[%s1835_s2] ss:$0 sm:$0xff]  ;;  %v1070_v20 = vld [vmem:[#allocation8] ss:$0 sm:$0xff]  ;;  %s1449_s29 = smov 96   ;;  %s1450_s17 = smov 88  }
  0x6c   : > { %1120 = vmatprep.subr.bf16.mxu1 %v1446_v8  ;;  %1114 = vmatprep.subr.bf16.mxu0 %v1446_v8  ;;  %s1451_s11 = smov 80   ;;  %s1452_s13 = smov 112   ;;  %vm426_vm2 = vcmask 64512   ;;  %vm490_vm3 = vcmask 1043456   ;;  %vm649_vm4 = vcmask 130112   ;;  %vm765_vm5 = vcmask 195712  }
  0x6d   : > { %1122 = vmatprep.mubr.msk.bf16.mxu1 %vm1447_vm1, %v1446_v8  ;;  %s1453_s18 = smov 72   ;;  %s1454_s19 = smov 104   ;;  %vm881_vm6 = vcmask 261312  }
  0x6e   : > { %s1455_s20 = smov 64   ;;  %s1456_s30 = smov 56  }
  0x6f   : > { %1115 = vmatpush3.bf16.msra.mxu0 %v1262_v9  ;;  %s1457_s9 = smov 48   ;;  %s1458_s21 = smov 40  }
  0x70   : > { %1126 = vmatprep.subr.bf16.mxu0 %v1446_v8  ;;  %s1459_s22 = smov 8   ;;  %p1854_p0 = scmp.ne.s32.totalorder %s1849_s15, 0 }
  0xf8   : > { %v330_v2 = vpop.xlane.xlu0 %329 }
  0xf9   : > { %v332_v3 = vmul.f32 0.03125, %v330_v2 }
  0xfb   : > { %v333_v4 = vsub.f32 %v1687_v0, %v332_v3 }
  0xfd   : > { %v334_v5 = vmul.f32 %v333_v4, %v333_v4 }
  0xff   : > { %v335_v6 = vsel %vm327_vm0, %v334_v5, 0.0 }
 0x100   : > { %336 = vadd.xlane.f32.xlu0 %v335_v6 }
 0x18d   : > { %v337_v10 = vpop.xlane.xlu0 %336 }
 0x18e   : > { %v338_v11 = vmul.f32 0.03125, %v337_v10 }
 0x190   : > { %v339_v12 = vadd.f32 1e-05, %v338_v11 }
 0x192   : > { %1265 = vrsqrt.f32 %v339_v12 }
 0x19c   : > { %v1266_v13 = vpop.eup %1265 }
 0x19d   : > { %v341_v15 = vmul.f32 %v1266_v13, %v333_v4 }
 0x19f   : > { %v348_v17 = vmul.f32 %v1068_v14, %v341_v15 }
 0x1a1   : > { %v355_v18 = vadd.f32 %v1069_v16, %v348_v17 }
 0x1a3   : > { %v356_v19 = vpack.c.bf16 %v355_v18, %v355_v18 }
 0x1a5   : > { %1117 = vmatmul.mubr.msk.bf16.vlgmr.msra.gmra.mrb[0].mxu0 %vm327_vm0, %v356_v19 }
 0x1a6   : > { %1128 = vmatprep.mubr.msk.bf16.mxu0 %vm1447_vm1, %v1446_v8 }
 0x278   : > { %v416_v21 = vpop.f32.mrb[0].mxu0 }
 0x279   : > { %v417_v22 = vadd.f32 %v1070_v20, %v416_v21  ;;  %v1118_v23 = vpop.f32.mrb[1].mxu0 }
 0x27a   : > { %v419_v24 = vpop.f32.mrb[2].mxu0 }
 0x27b   : > { %v1710_v25 = vpack.c.bf16 %v417_v22, %v417_v22  ;;  %v1119_v26 = vpop.f32.mrb[3].mxu0 }
 0x27d   : > { %535 = vrot.lane.b32.xlu0 %v1710_v25, %s1448_s23  ;;  %424 = vrot.lane.b32.xlu1 %v1710_v25, %s1449_s29 }
 0x281   : > { %537 = vrot.lane.b32.xlu1 %v1710_v25, %s1450_s17  ;;  %s1462_s17 = smov [#allocation9]  }
 0x285   : > { %653 = vrot.lane.b32.xlu1 %v1710_v25, %s1451_s11  ;;  %s1373_s11 = sshll.u32 %s1462_s17, 4  ;;  %s1374_s11 = int_to_ptr.vmem [resolvable:$false] %s1373_s11 }
 0x289   : > { %651 = vrot.lane.b32.xlu1 %v1710_v25, %s1452_s13  ;;  %s1460_s13 = smov 16  }
 0x28d   : > { %769 = vrot.lane.b32.xlu1 %v1710_v25, %s1453_s18  ;;  %s1461_s18 = smov 24  }
 0x291   : > { %767 = vrot.lane.b32.xlu1 %v1710_v25, %s1454_s19 }
 0x2ef   : > { %v425_v27 = vpop.permute.xlu1 %424  ;;  %v536_v32 = vpop.permute.xlu0 %535 }
 0x2f0   : > { %v431_v28 = vsel %vm426_vm2, %v425_v27, 0 }
 0x2f1   : > { %1121 = vmatpush3.bf16.xpose.msra.mxu1 %v431_v28 }
 0x2f2   : > { %1132 = vmatprep.subr.bf16.mxu1 %v1446_v8 }
 0x2f3   : > { %v538_v29 = vpop.permute.xlu1 %537 }
 0x2f4   : > { %v543_v30 = vsel %vm426_vm2, %v538_v29, 0 }
 0x2f7   : > { %v654_v31 = vpop.permute.xlu1 %653 }
 0x2f8   : > { %1123 = vmatmul.mubr.msk.bf16.vlgmr.msra.gmra.mrb[0].mxu1 %vm426_vm2, %v1710_v25  ;;  %v659_v34 = vsel %vm426_vm2, %v654_v31, 0 }
 0x2f9   : > { %1133 = vmatpush3.bf16.xpose.msra.mxu1 %v543_v30  ;;  %1134 = vmatprep.mubr.msk.bf16.mxu1 %vm1447_vm1, %v1446_v8 }
 0x2fa   : > { %1144 = vmatprep.subr.bf16.mxu1 %v1446_v8 }
 0x2fb   : > { %v652_v33 = vpop.permute.xlu1 %651 }
 0x2ff   : > { %v770_v35 = vpop.permute.xlu1 %769 }
 0x300   : > { %1135 = vmatmul.mubr.msk.bf16.vlgmr.msra.gmra.mrb[4].mxu1 %vm426_vm2, %v536_v32  ;;  %v775_v36 = vsel %vm426_vm2, %v770_v35, 0 }
 0x301   : > { %1145 = vmatpush3.bf16.xpose.msra.mxu1 %v659_v34  ;;  %1146 = vmatprep.mubr.msk.bf16.mxu1 %vm1447_vm1, %v1446_v8 }
 0x302   : > { %1156 = vmatprep.subr.bf16.mxu1 %v1446_v8 }
 0x303   : > { %v768_v37 = vpop.permute.xlu1 %767 }
 0x308   : > { %1147 = vmatmul.mubr.msk.bf16.vlgmr.msra.gmra.mrb[8].mxu1 %vm426_vm2, %v652_v33 }
 0x309   : > { %1157 = vmatpush3.bf16.xpose.msra.mxu1 %v775_v36  ;;  %1158 = vmatprep.mubr.msk.bf16.mxu1 %vm1447_vm1, %v1446_v8 }
 0x30a   : > { %1168 = vmatprep.subr.bf16.mxu1 %v1446_v8 }
 0x310   : > { %1159 = vmatmul.mubr.msk.bf16.vlgmr.msra.gmra.mrb[12].mxu1 %vm426_vm2, %v768_v37 }
 0x311   : > { %1172 = vmatprep.mubr.msk.bf16.mxu1 %vm1447_vm1, %v1446_v8 }
 0x3cb   : > { %v467_v38 = vpop.f32.mrb[0].mxu1 }
 0x3cc   : > { %v1124_v39 = vpop.f32.mrb[1].mxu1  ;;  %v473_v40 = vsel %vm426_vm2, %v467_v38, -inf }
 0x3cd   : > { %474 = vmax.xlane.f32.xlu1 %v473_v40  ;;  %v470_v41 = vpop.f32.mrb[2].mxu1 }
 0x3ce   : > { %v1125_v42 = vpop.f32.mrb[3].mxu1 }
 0x3d3   : > { %v579_v43 = vpop.f32.mrb[4].mxu1 }
 0x3d4   : > { %v1136_v44 = vpop.f32.mrb[5].mxu1  ;;  %v585_v45 = vsel %vm426_vm2, %v579_v43, -inf }
 0x3d5   : > { %586 = vmax.xlane.f32.xlu0 %v585_v45  ;;  %v582_v46 = vpop.f32.mrb[6].mxu1 }
 0x3d6   : > { %v1137_v47 = vpop.f32.mrb[7].mxu1 }
 0x3db   : > { %v695_v48 = vpop.f32.mrb[8].mxu1 }
 0x3dc   : > { %v1148_v49 = vpop.f32.mrb[9].mxu1  ;;  %v701_v50 = vsel %vm426_vm2, %v695_v48, -inf }
 0x3dd   : > { %702 = vmax.xlane.f32.xlu1 %v701_v50  ;;  %v698_v51 = vpop.f32.mrb[10].mxu1  ;;  %v1264_v49 = vld [vmem:[%s1838_s5 + $0x8] sm:$0xff]  }
 0x3de   : > { %v1149_v52 = vpop.f32.mrb[11].mxu1 }
 0x3e3   : > { %v811_v53 = vpop.f32.mrb[12].mxu1 }
 0x3e4   : > { %v1160_v54 = vpop.f32.mrb[13].mxu1  ;;  %v817_v55 = vsel %vm426_vm2, %v811_v53, -inf }
 0x3e5   : > { %818 = vmax.xlane.f32.xlu0 %v817_v55  ;;  %v814_v56 = vpop.f32.mrb[14].mxu1 }
 0x3e6   : > { %v1161_v57 = vpop.f32.mrb[15].mxu1 }
 0x45a   : > { %v475_v58 = vpop.xlane.xlu1 %474 }
 0x45b   : > { %v476_v59 = vsub.f32 %v467_v38, %v475_v58 }
 0x45d   : > { %v477_v60 = vmul.f32 1.442695, %v476_v59 }
 0x45f   : > { %1267 = vpow2.f32 %v477_v60 }
 0x462   : > { %v587_v61 = vpop.xlane.xlu0 %586 }
 0x463   : > { %v588_v62 = vsub.f32 %v579_v43, %v587_v61 }
 0x465   : > { %v589_v63 = vmul.f32 1.442695, %v588_v62  ;;  %v1085_v62 = vld [vmem:[%s1839_s6] ss:$0 sm:$0xff] }
 0x467   : > { %1269 = vpow2.f32 %v589_v63 }
 0x469   : > { %v1268_v1 = vpop.eup %1267 }
 0x46a   : > { %v479_v2 = vsel %vm426_vm2, %v1268_v1, 0.0  ;;  %v703_v11 = vpop.xlane.xlu1 %702 }
 0x46b   : > { %480 = vadd.xlane.f32.xlu1 %v479_v2  ;;  %v704_v12 = vsub.f32 %v695_v48, %v703_v11  ;;  %v1263_v48 = vld [vmem:[%s1838_s5] sm:$0xff]  }
 0x46c   : > { %1169 = vmatpush3.bf16.msra.mxu1 %v1263_v48 }
 0x46d   : > { %v705_v13 = vmul.f32 1.442695, %v704_v12  ;;  %1170 = vmatprep.subr.bf16.mxu1 %v1446_v8 }
 0x470   : > { %1171 = vmatpush3.bf16.msra.mxu1 %v1264_v49 }
 0x471   : > { %v1270_v3 = vpop.eup %1269 }
 0x472   : > { %v819_v4 = vpop.xlane.xlu0 %818  ;;  %v591_v5 = vsel %vm426_vm2, %v1270_v3, 0.0 }
 0x473   : > { %v820_v6 = vsub.f32 %v811_v53, %v819_v4  ;;  %592 = vadd.xlane.f32.xlu0 %v591_v5 }
 0x475   : > { %v821_v7 = vmul.f32 1.442695, %v820_v6 }
 0x477   : > { %1271 = vpow2.f32 %v821_v7 }
 0x478   : > { %1273 = vpow2.f32 %v705_v13 }
 0x47c   : > { %485 = vrot.lane.b32.xlu1 %v1710_v25, %s1455_s20 }
 0x481   : > { %v1272_v9 = vpop.eup %1271 }
 0x482   : > { %v823_v10 = vsel %vm426_vm2, %v1272_v9, 0.0  ;;  %v1274_v14 = vpop.eup %1273 }
 0x483   : > { %824 = vadd.xlane.f32.xlu0 %v823_v10  ;;  %v707_v15 = vsel %vm426_vm2, %v1274_v14, 0.0 }
 0x499   : > { %597 = vrot.lane.b32.xlu0 %v1710_v25, %s1456_s30  ;;  %s1087_s30 = sshll.u32 %s1524_s28, 7  ;;  %s954_s28 = scalar_lea.sflag [#allocation5], %s1673_s12 }
 0x49a   : > { %s1788_s29 = scalar_lea.hbm %s1840_s7, %s1087_s30 }
 0x4a0   : > { %708 = vadd.xlane.f32.xlu1 %v707_v15 }
 0x4b1   : > { %713 = vrot.lane.b32.xlu1 %v1710_v25, %s1457_s9  ;;  %s320_s9 = scalar_lea.vmem [#allocation9], %s1064_s14 }
 0x4b5   : > { %829 = vrot.lane.b32.xlu1 %v1710_v25, %s1458_s21  ;;  %s967_s21 = sshll.u32 %s320_s9, 4  ;;  %s1790_s21 = int_to_ptr.vmem [resolvable:$true] %s967_s21 }
 0x4b6   : > { %s1369_s14 = scalar_lea.vmem %s1790_s21, 128  ;;  %p1376_p7 = scmp.lt.s32.totalorder %s1790_s21, %s1374_s11 }
 0x4b7   : > { %p1370_p11 = scmp.ne.s32.totalorder %s1790_s21, %s1369_s14 }
 0x4b9   : > { %p1371_p1 = pnand %p1370_p11, %p1854_p0 }
 0x4bb   : > { %p1372_p3 = pneg %p1371_p1 }
 0x4f8   : > { %v481_v16 = vpop.xlane.xlu1 %480 }
 0x4f9   : > { %1275 = vrcp.f32 %v481_v16 }
 0x4fc   : > { %v486_v17 = vpop.permute.xlu1 %485 }
 0x4fd   : > { %v492_v18 = vsel %vm490_vm3, %v486_v17, 0 }
 0x4fe   : > { %1127 = vmatpush3.bf16.msra.mxu0 %v492_v18 }
 0x4ff   : > { %1138 = vmatprep.subr.bf16.mxu0 %v1446_v8 }
 0x500   : > { %v593_v20 = vpop.xlane.xlu0 %592 }
 0x501   : > { %1277 = vrcp.f32 %v593_v20 }
 0x503   : > { %v1276_v19 = vpop.eup %1275 }
 0x504   : > { %v483_v21 = vmul.f32 %v1276_v19, %v1268_v1 }
 0x506   : > { %v484_v22 = vpack.c.bf16 %v483_v21, %v483_v21 }
 0x508   : > { %1129 = vmatmul.mubr.msk.bf16.vlgmr.msra.gmra.mrb[4].mxu0 %vm426_vm2, %v484_v22 }
 0x509   : > { %1140 = vmatprep.mubr.msk.bf16.mxu0 %vm1447_vm1, %v1446_v8 }
 0x50b   : > { %v1278_v23 = vpop.eup %1277 }
 0x50c   : > { %v595_v25 = vmul.f32 %v1278_v23, %v1270_v3 }
 0x50e   : > { %v596_v28 = vpack.c.bf16 %v595_v25, %v595_v25 }
 0x510   : > { %v825_v24 = vpop.xlane.xlu0 %824 }
 0x514   : > { %v598_v26 = vpop.permute.xlu0 %597 }
 0x515   : > { %v603_v27 = vsel %vm490_vm3, %v598_v26, 0 }
 0x516   : > { %1139 = vmatpush3.bf16.msra.mxu0 %v603_v27 }
 0x517   : > { %1150 = vmatprep.subr.bf16.mxu0 %v1446_v8 }
 0x519   : > { %1141 = vmatmul.mubr.msk.bf16.vlgmr.msra.gmra.mrb[8].mxu0 %vm426_vm2, %v596_v28 }
 0x51a   : > { %1152 = vmatprep.mubr.msk.bf16.mxu0 %vm1447_vm1, %v1446_v8 }
 0x52d   : > { %v709_v29 = vpop.xlane.xlu1 %708 }
 0x52e   : > { %1279 = vrcp.f32 %v709_v29 }
 0x52f   : > { %1281 = vrcp.f32 %v825_v24 }
 0x531   : > { %v714_v30 = vpop.permute.xlu1 %713 }
 0x532   : > { %v719_v31 = vsel %vm490_vm3, %v714_v30, 0 }
 0x533   : > { %1151 = vmatpush3.bf16.msra.mxu0 %v719_v31 }
 0x534   : > { %1162 = vmatprep.subr.bf16.mxu0 %v1446_v8 }
 0x535   : > { %v830_v34 = vpop.permute.xlu1 %829 }
 0x536   : > { %v835_v37 = vsel %vm490_vm3, %v830_v34, 0 }
 0x538   : > { %v1280_v32 = vpop.eup %1279 }
 0x539   : > { %v711_v33 = vmul.f32 %v1280_v32, %v1274_v14  ;;  %v1282_v36 = vpop.eup %1281 }
 0x53a   : > { %v827_v38 = vmul.f32 %v1282_v36, %v1272_v9 }
 0x53b   : > { %v712_v35 = vpack.c.bf16 %v711_v33, %v711_v33 }
 0x53c   : > { %v828_v39 = vpack.c.bf16 %v827_v38, %v827_v38 }
 0x53d   : > { %1153 = vmatmul.mubr.msk.bf16.vlgmr.msra.gmra.mrb[12].mxu0 %vm426_vm2, %v712_v35 }
 0x53e   : > { %1163 = vmatpush3.bf16.msra.mxu0 %v835_v37  ;;  %1164 = vmatprep.mubr.msk.bf16.mxu0 %vm1447_vm1, %v1446_v8 }
 0x545   : > { %1165 = vmatmul.mubr.msk.bf16.vlgmr.msra.gmra.mrb[16].mxu0 %vm426_vm2, %v828_v39 }
 0x5db   : > { %v528_v40 = vpop.f32.mrb[4].mxu0 }
 0x5dc   : > { %534 = vst.msk [vmem:[#allocation2] sm:$0xff] %vm426_vm2, %v528_v40  ;;  %v1130_v41 = vpop.f32.mrb[5].mxu0 }
 0x5dd   : > { %v531_v42 = vpop.f32.mrb[6].mxu0 }
 0x5de   : > { %v1131_v43 = vpop.f32.mrb[7].mxu0 }
 0x5ec   : > { %v639_v44 = vpop.f32.mrb[8].mxu0 }
 0x5ed   : > { %646 = vrot.lane.b32.xlu0 %v639_v44, %s1459_s22  ;;  %v1142_v45 = vpop.f32.mrb[9].mxu0 }
 0x5ee   : > { %v642_v46 = vpop.f32.mrb[10].mxu0 }
 0x5ef   : > { %v1143_v47 = vpop.f32.mrb[11].mxu0 }
 0x610   : > { %v755_v50 = vpop.f32.mrb[12].mxu0 }
 0x611   : > { %762 = vrot.lane.b32.xlu1 %v755_v50, %s1460_s13  ;;  %v1154_v51 = vpop.f32.mrb[13].mxu0  ;;  %s1375_s13 = scalar_lea.vmem %s1374_s11, 256 }
 0x612   : > { %v758_v52 = vpop.f32.mrb[14].mxu0  ;;  %p1377_p9 = scmp.lt.s32.totalorder %s1375_s13, %s1369_s14 }
 0x613   : > { %v1155_v53 = vpop.f32.mrb[15].mxu0 }
 0x614   : > { %p1378_p12 = por %p1377_p9, %p1376_p7 }
 0x616   : > { %p1379_p2 = pnand %p1378_p12, %p1372_p3 }
 0x618   : > { %v871_v54 = vpop.f32.mrb[16].mxu0 }
 0x619   : > { %878 = vrot.lane.b32.xlu0 %v871_v54, %s1461_s18  ;;  %v1166_v55 = vpop.f32.mrb[17].mxu0 }
 0x61a   : > { %v874_v56 = vpop.f32.mrb[18].mxu0 }
 0x61b   : > { %v1167_v57 = vpop.f32.mrb[19].mxu0 }
 0x65f   : > { %v647_v58 = vpop.permute.xlu0 %646 }
 0x660   : > { %650 = vst.msk [vmem:[#allocation2] sm:$0xff] %vm649_vm4, %v647_v58 }
 0x683   : > { %v763_v8 = vpop.permute.xlu1 %762 }
 0x684   : > { %766 = vst.msk [vmem:[#allocation2] sm:$0xff] %vm765_vm5, %v763_v8 }
 0x68b   : > { %v879_v59 = vpop.permute.xlu0 %878 }
 0x68c   : > { %882 = vst.msk [vmem:[#allocation2] sm:$0xff] %vm881_vm6, %v879_v59 }
 0x693   : > { %v883_v60 = vld [vmem:[#allocation2] sm:$0xff] }
 0x694   : > { %v884_v61 = vpack.c.bf16 %v883_v60, %v883_v60 }
 0x696   : > { %1173 = vmatmul.mubr.msk.bf16.vlgmr.msra.gmra.mrb[16].mxu1 %vm327_vm0, %v884_v61 }
 0x769   : > { %v938_v63 = vpop.f32.mrb[16].mxu1 }
 0x76a   : > { %v944_v1 = vadd.f32 %v938_v63, %v1687_v0  ;;  %v1174_v2 = vpop.f32.mrb[17].mxu1 }
 0x76b   : > { %v941_v3 = vpop.f32.mrb[18].mxu1 }
 0x76c   : > { %v951_v4 = vadd.f32 %v1085_v62, %v944_v1  ;;  %v1175_v5 = vpop.f32.mrb[19].mxu1 }
 0x76e   : > { %952 = vst.msk [vmem:[%s320_s9] sm:$0xff] %vm327_vm0, %v951_v4 }
 0x76f   : > { %1382 = shalt.err (!%p1379_p2)
}
 0x770   : > { %s1383_s12 = scalar_lea.hbm %s1788_s29, 128  ;;  %s1387_s20 = scalar_lea.hbm %s1840_s7, 256 }
 0x771   : > { %p1384_p13 = scmp.ne.s32.totalorder %s1788_s29, %s1383_s12  ;;  %p1388_p4 = scmp.lt.u32.totalorder %s1788_s29, %s1840_s7 }
 0x772   : > { %p1389_p5 = scmp.lt.u32.totalorder %s1387_s20, %s1383_s12  ;;  %p1391_p11 = scmp.lt.u32.totalorder %s1383_s12, %s1788_s29 }
 0x773   : > { %p1385_p6 = pnand %p1384_p13, %p1854_p0 }
 0x774   : > { %p1390_p8 = por %p1389_p5, %p1388_p4 }
 0x775   : > { %p1386_p10 = pneg %p1385_p6 }
 0x776   : > { %p1392_p1 = por %p1391_p11, %p1390_p8 }
 0x778   : > { %p1393_p3 = pnand %p1392_p1, %p1386_p10 }
 0x77a   : > { %1396 = shalt.err (!%p1393_p3)
}
 0x77b   : > { %1186 = dma.vmem_to_hbm [thread:$0]  (%p1854_p0), %s1790_s21, 128, %s1788_s29, %s954_s28  }
 0x77c PF: > { %s979_s22 = sand.u32 1, %s1427_s24   ;;  %p1855_p7 = scmp.ne.s32.totalorder %s1845_s8, 0 }
 0x77d   : > { %p1856_p9 = scmp.ge.s32.totalorder %s1439_s27, 2  ;;  %s980_s23 = scalar_lea.sflag [#allocation5], %s979_s22 }
 0x77f   : > { %p1200_p12 = pnand %p1856_p9, %p1855_p7 }
 0x781   : > { %1422 = dma.done.wait (!%p1200_p12), %s980_s23, 128  }
 0x782   : > { %1424 = vsyncadd (!%p1200_p12), %s980_s23, 4294967168  ;;  %p21_p2 = scmp.ge.s32.totalorder %s1614_s10, 4   ;;  %s1857_s24 = smov %s1431_s25 }
 0x783   : > { %s1858_s25 = smov %s1435_s26  ;;  %s1859_s26 = smov %s1630_s16 }
 0x784   : > { %s1860_s27 = smov %s1614_s10  ;;  %23 = sbr.rel (!%p21_p2) target bundleno = 6 (0x6), region = 101 }
 0x78b   :  { %985 = vsyncpa [#allocation4], 1 }
 0x78c   :  { %987 = vsyncpa [#allocation4 + $0x1], 1 }
 0x78d   :  { %988 = vsyncpa [#allocation7], 1 }
 0x78e   :  { %989 = vsyncpa [#allocation5], 1 }
 0x78f   :  { %991 = vsyncpa [#allocation5 + $0x1], 1 }

</bundles_post_ra>
